<compile_context>
chip_gen: v7x
topology: tpu7x:2x2x1
jax: 0.10.0
libtpu: 0.0.40
codegen_flags: <defaults>
</compile_context>

<pallas_src>
import functools
from math import log2

import jax
import jax.numpy as jnp
from jax import lax
from jax.experimental import pallas as pl
from jax.experimental.pallas import tpu as pltpu

_LANE = 128
_MIN_PALLAS_BYTES = 256 * 1024          # below this, XLA's fused reduce wins
_MAX_TILE_BYTES = 32 * 1024 * 1024      # per input buffer, upper clamp
_MIN_TILE_BYTES = 1 * 1024 * 1024       # per input buffer, lower clamp


def _sublane_multiple(itemsize):
    """Row-block granularity: rows map to sublanes (8 for 32-bit, 16 bf16, 32 i8)."""
    return 8 * max(1, 4 // itemsize)


def _vmem_budget_bytes():
    """Generation-aware scoped-VMEM budget (v7x: 64 MiB phys, v5e/v6e: 128 MiB)."""
    phys = None
    try:
        phys = getattr(pltpu.get_tpu_info(), "vmem_capacity_bytes", None)
    except Exception:
        phys = None
    if not phys:
        phys = 64 * 1024 * 1024          # conservative default = smallest (v7x)
    return int(min(phys * 3 // 4, 96 * 1024 * 1024))


def _choose_tiles(n_rows, length, itemsize, tile_target):
    """Pick (row_tile, lane_tile).

    One input buffer stays ~<= tile_target (Pallas double-buffers it), the row
    ("parallel") axis keeps >=2..4 grid steps when the input is big enough so
    both v7x TensorCores get work, row tiles are sublane-granular, and the lane
    axis only gets its own reduction dimension when full-L rows cannot fit.
    """
    sub = _sublane_multiple(itemsize)
    lane_len = pl.cdiv(length, _LANE) * _LANE          # VMEM lane padding

    if lane_len * itemsize * sub <= tile_target:
        lane_tile = length                              # full L: no reduction loop
        tile_lane_bytes = lane_len * itemsize
    else:
        lane_tile = max(_LANE,
                        (tile_target // (sub * itemsize)) // _LANE * _LANE)
        tile_lane_bytes = lane_tile * itemsize

    total_bytes = n_rows * lane_len * itemsize
    min_steps = int(min(4, max(1, pl.cdiv(total_bytes, 1 << 20))))
    row_vmem = max(sub, tile_target // tile_lane_bytes)
    row_steps = max(sub, pl.cdiv(n_rows, min_steps))
    row_tile = min(n_rows, row_vmem, row_steps)
    if row_tile < n_rows:                               # partial blocks: sublane multiple
        row_tile = max(sub, row_tile // sub * sub)
        row_tile = min(row_tile, n_rows)
    return int(row_tile), int(lane_tile)


def _pool_kernel(x_ref, o_ref, *, inv_divisor):
    # Full-L block: reduce over lanes with f32 accumulation, scale by the
    # static reciprocal power of two, cast, store a (TR, 1) column.
    s = jnp.sum(x_ref[...], axis=-1, keepdims=True, dtype=jnp.float32)
    o_ref[...] = (s * inv_divisor).astype(o_ref.dtype)


def _pool_acc_kernel(x_ref, o_ref, acc_ref, *, inv_divisor, length, lane_tile):
    # L-tiled path: grid = (rows, l_blocks), reduction axis last ("arbitrary").
    j = pl.program_id(1)

    @pl.when(j == 0)
    def _():
        acc_ref[...] = jnp.zeros_like(acc_ref)

    x = x_ref[...]
    if length % lane_tile:           # static: mask the ragged final lane block
        lane = lax.broadcasted_iota(jnp.int32, x.shape, dimension=1)
        x = jnp.where(j * lane_tile + lane < length, x, 0)
    acc_ref[...] += jnp.sum(x, axis=-1, keepdims=True, dtype=jnp.float32)

    @pl.when(j == pl.num_programs(1) - 1)
    def _():
        o_ref[...] = (acc_ref[...] * inv_divisor).astype(o_ref.dtype)


def bitshift_approx_average_pool(x, return_pool_divisor=False, *,
                                 force_pallas=False, vmem_budget_bytes=None):
    """x: (N, C, L) or (C, L). Returns sum over the last axis divided by the
    power of two nearest to L (Python round(log2(L)), like the torch module)."""
    squeeze_batch = x.ndim == 2
    if squeeze_batch:
        x = x[None]                      # (1, C, L)
    assert x.ndim == 3, "expected (N, C, L) or (C, L)"

    N, C, L = x.shape
    divisor = 2 ** round(log2(L))        # static, host-side, like PyTorch
    inv_divisor = 1.0 / float(divisor)
    itemsize = jnp.dtype(x.dtype).itemsize
    R = N * C
    total_bytes = R * L * itemsize

    if total_bytes < _MIN_PALLAS_BYTES and not force_pallas:
        # Tiny input: pallas_call launch/step overhead dominates; XLA's fused
        # reduction is already at roofline and can fuse with neighbors.
        out = (jnp.sum(x, axis=-1, dtype=jnp.float32) * inv_divisor).astype(x.dtype)
    else:
        budget = int(vmem_budget_bytes) if vmem_budget_bytes else _vmem_budget_bytes()
        tile_target = min(_MAX_TILE_BYTES, max(_MIN_TILE_BYTES, budget // 3))
        vmem_limit = int(min(max(budget, 32 * 1024 * 1024), 96 * 1024 * 1024))

        xf = x.reshape(R, L)             # free: contiguous row-major
        TR, TL = _choose_tiles(R, L, itemsize, tile_target)
        row_steps = pl.cdiv(R, TR)

        if TL == L:
            grid = (row_steps,)
            kernel = functools.partial(_pool_kernel, inv_divisor=inv_divisor)
            in_specs = [pl.BlockSpec((TR, L), lambda i: (i, 0))]
            out_specs = pl.BlockSpec((TR, 1), lambda i: (i, 0))
            scratch_shapes = ()
            dim_sem = ("parallel",)
        else:
            grid = (row_steps, pl.cdiv(L, TL))          # reduction axis last
            kernel = functools.partial(_pool_acc_kernel, inv_divisor=inv_divisor,
                                       length=L, lane_tile=TL)
            in_specs = [pl.BlockSpec((TR, TL), lambda i, j: (i, j))]
            out_specs = pl.BlockSpec((TR, 1), lambda i, j: (i, 0))
            scratch_shapes = (pltpu.VMEM((TR, 1), jnp.float32),)
            dim_sem = ("parallel", "arbitrary")

        out_flat = pl.pallas_call(
            kernel,
            out_shape=jax.ShapeDtypeStruct((R, 1), x.dtype),
            grid=grid,
            in_specs=in_specs,
            out_specs=out_specs,
            scratch_shapes=scratch_shapes,
            compiler_params=pltpu.CompilerParams(
                dimension_semantics=dim_sem,
                vmem_limit_bytes=vmem_limit,
            ),
            cost_estimate=pl.CostEstimate(
                flops=R * L,
                transcendentals=0,
                bytes_accessed=R * L * itemsize + R * itemsize,
            ),
        )(xf)
        out = out_flat.reshape(N, C)

    if squeeze_batch:
        out = out[0]
    if return_pool_divisor:
        return out, divisor
    return out


if __name__ == "__main__":
    key = jax.random.PRNGKey(0)

    # (N, C, L) path at module-typical small shape (forced through the kernel).
    N, C, L = 2, 4, 16
    x = jax.random.normal(key, (N, C, L), dtype=jnp.float32)
    out, div = bitshift_approx_average_pool(x, return_pool_divisor=True,
                                            force_pallas=True)
    out = jax.block_until_ready(out)
    ref = jnp.sum(x, axis=-1) / (2 ** round(log2(L)))
    assert out.shape == (N, C)
    assert div == 16
    assert jnp.allclose(out, ref, atol=1e-6, rtol=1e-6)

    # (C, L) path.
    x2 = jax.random.normal(jax.random.PRNGKey(1), (C, L), dtype=jnp.float32)
    out2 = jax.block_until_ready(
        bitshift_approx_average_pool(x2, force_pallas=True))
    ref2 = jnp.sum(x2, axis=-1) / (2 ** round(log2(L)))
    assert out2.shape == (C,)
    assert jnp.allclose(out2, ref2, atol=1e-6, rtol=1e-6)

    # Larger shape exercising the multi-step, double-buffered row grid
    # (>= 4 "parallel" steps so v7x's two TensorCores are both used).
    N3, C3, L3 = 16, 512, 160
    x3 = jax.random.normal(jax.random.PRNGKey(2), (N3, C3, L3), dtype=jnp.float32)
    out3 = jax.block_until_ready(bitshift_approx_average_pool(x3))
    ref3 = jnp.sum(x3, axis=-1) / (2 ** round(log2(L3)))
    assert out3.shape == (N3, C3)
    assert jnp.allclose(out3, ref3, atol=1e-4, rtol=1e-5)

    # Long-L shape exercising the L-tiled accumulator path (pl.when init /
    # finalize + ragged final lane block masking).  A small VMEM-budget
    # override forces the path so it is covered on every TPU generation.
    N4, C4, L4 = 2, 8, 40960
    x4 = jax.random.normal(jax.random.PRNGKey(3), (N4, C4, L4), dtype=jnp.float32)
    out4 = jax.block_until_ready(
        bitshift_approx_average_pool(x4, vmem_budget_bytes=3 * 1024 * 1024))
    ref4 = jnp.sum(x4, axis=-1) / (2 ** round(log2(L4)))
    assert out4.shape == (N4, C4)
    assert jnp.allclose(out4, ref4, atol=1e-4, rtol=1e-4)

    print("KERNEL_OK")
</pallas_src>

<mosaic_0001>
module attributes {stable_mosaic.version = 11 : i64} {
  func.func @_pool_kernel(%arg0: i32, %arg1: memref<8x16xf32, #tpu.memory_space<vmem>>, %arg2: memref<8x1xf32, #tpu.memory_space<vmem>>) attributes {dimension_semantics = [#tpu.dimension_semantics<parallel>], iteration_bounds = array<i64: 1>, scalar_prefetch = 0 : i64, scratch_operands = 0 : i64, tpu.core_type = #tpu.core_type<tc>, window_params = [{transform_indices = @transform_0, window_bounds = array<i64: 8, 16>}, {transform_indices = @transform_1, window_bounds = array<i64: 8, 1>}]} {
    %c0 = arith.constant 0 : index
    %c0_0 = arith.constant 0 : index
    %0 = vector.load %arg1[%c0, %c0_0] : memref<8x16xf32, #tpu.memory_space<vmem>>, vector<8x16xf32>
    %cst = arith.constant dense<0.000000e+00> : vector<8xf32>
    %1 = vector.multi_reduction <add>, %0, %cst [1] : vector<8x16xf32> to vector<8xf32>
    %2 = vector.shape_cast %1 : vector<8xf32> to vector<8x1xf32>
    %cst_1 = arith.constant 6.250000e-02 : f32
    %3 = vector.broadcast %cst_1 : f32 to vector<8x1xf32>
    %4 = arith.mulf %2, %3 : vector<8x1xf32>
    %c0_2 = arith.constant 0 : index
    %c0_3 = arith.constant 0 : index
    %5 = vector.load %arg2[%c0_2, %c0_3] : memref<8x1xf32, #tpu.memory_space<vmem>>, vector<8x1xf32>
    tpu.vector_store %arg2[%c0_2, %c0_3], %4 {strides = array<i32>} : memref<8x1xf32, #tpu.memory_space<vmem>>, vector<8x1xf32>,
    return
  }
  func.func @transform_0(%arg0: i32) -> (i32, i32) {
    %c0_i32 = arith.constant 0 : i32
    %c0_i32_0 = arith.constant 0 : i32
    return %arg0, %c0_i32 : i32, i32
  }
  func.func @transform_1(%arg0: i32) -> (i32, i32) {
    %c0_i32 = arith.constant 0 : i32
    %c0_i32_0 = arith.constant 0 : i32
    return %arg0, %c0_i32 : i32, i32
  }
}

</mosaic_0001>

<bundles_post_ra>
// kernel: tpu_custom_call.1
= control target key start
LH: loop header
LB: loop body
LE: loop exit
PB: predicated region body
PF: predicated region fallthrough
CT: control target
= control target key end

     0   :  { %6 = vsyncpa [#allocation3], 0  ;;  %s58_s6 = smov [#allocation2]   ;;  %s84_s0 = inlined_call_operand.hbm [shape: f32[8,16], index: 0, kind: input, shape index: {}]   ;;  %s85_s1 = inlined_call_operand.vmem [shape: f32[8,1], index: 1, kind: output, shape index: {}]  }
   0x1   :  { %s13_s7 = sshll.u32 %s58_s6, 4  ;;  %s34_s10 = scalar_lea.hbm %s84_s0, 128  ;;  %s14_s7 = int_to_ptr.vmem [resolvable:$true] %s13_s7 }
   0x2   :  { %p35_p0 = scmp.ne.s32.totalorder %s84_s0, %s34_s10  ;;  %p38_p1 = scmp.lt.u32.totalorder %s34_s10, %s84_s0 }
   0x4   :  { %p40_p2 = pnand %p38_p1, %p35_p0 }
   0x6   :  { %43 = shalt.err (!%p40_p2)
}
   0x7   :  { %s44_s15 = scalar_lea.vmem %s14_s7, 128  ;;  %p49_p4 = scmp.lt.s32.totalorder %s14_s7, %s14_s7 }
   0x8   :  { %p45_p3 = scmp.ne.s32.totalorder %s14_s7, %s44_s15  ;;  %p50_p5 = scmp.lt.s32.totalorder %s44_s15, %s44_s15 }
   0xa   :  { %p51_p6 = por %p50_p5, %p49_p4 }
   0xc   :  { %p52_p7 = pnand %p51_p6, %p45_p3 }
   0xe   :  { %55 = shalt.err (!%p52_p7)
}
   0xf   :  { %16 = dma.hbm_to_vmem [thread:$0]  %s84_s0, 128, %s14_s7, [#allocation3]  }
  0x10   :  { %56 = dma.done.wait [#allocation3], 128  }
  0x11   :  { %57 = vsyncadd [#allocation3], 4294967168  ;;  %vm21_vm0 = vcmask 130048   ;;  %v20_v0 = vld [vmem:[#allocation2] sm:$0xff]  ;;  %vm26_vm1 = vcmask 7168  }
  0x12   :  { %v22_v1 = vsel %vm21_vm0, %v20_v0, 0.0 }
  0x13   :  { %23 = vadd.xlane.f32.xlu0 %v22_v1 }
  0xa0   :  { %v24_v2 = vpop.xlane.xlu0 %23 }
  0xa1   :  { %v25_v3 = vmul.f32 0.0625, %v24_v2 }
  0xa3   :  { %27 = vst.msk [vmem:[%s85_s1] sm:$0xff] %vm26_vm1, %v25_v3 }
  0xa4   :  { %32 = vsyncpa [#allocation3], 1 }

</bundles_post_ra>
